<compile_context>
chip_gen: v7x
topology: tpu7x:2x2x1
jax: 0.10.0
libtpu: 0.0.40
codegen_flags: <defaults>
</compile_context>

<pallas_src>
import functools

import jax
import jax.numpy as jnp
from jax.experimental import pallas as pl
from jax.experimental.pallas import tpu as pltpu


def _round_up(x, m):
    return ((x + m - 1) // m) * m


def _maploss_kernel(pred_ref, tgt_ref, out_ref, *, normalize, scale, tb,
                    batch, masked):
    """One row-tile: (tb, C) inputs -> (1, 1, 1) partial loss sum."""
    pred = pred_ref[...].astype(jnp.float32)   # (tb, C)
    tgt = tgt_ref[...].astype(jnp.float32)     # (tb, C)
    C = pred.shape[1]

    if normalize:
        maxes = jnp.max(pred, axis=1, keepdims=True)              # XLU, (tb, 1)
        # Per-row reciprocal + one broadcast multiply instead of tb*C divides.
        inv = jnp.float32(1.0) / (maxes + jnp.float32(1e-6))      # (tb, 1)
        pred = pred * inv

    diff = tgt - pred * tgt                                       # VPU, (tb, C)

    # Lane reductions on the (otherwise idle) MXU via a ones((C,1)) matvec;
    # ones is exactly representable so row sums keep f32 accuracy, and the
    # matmul uses a separate VLIW slot from the VALU/XLU.
    ones_c = jnp.ones((C, 1), dtype=jnp.float32)
    pos = jnp.dot(diff * diff, ones_c,
                  preferred_element_type=jnp.float32)             # (tb, 1)

    if masked:
        row = pl.program_id(0) * tb + jax.lax.broadcasted_iota(
            jnp.int32, (tb, 1), 0)
        valid = row < batch                                       # (tb, 1)
    else:
        valid = None

    if scale:
        factor = jnp.dot(tgt, ones_c,
                         preferred_element_type=jnp.float32)      # (tb, 1)
        if masked:
            # Rows past the real batch hold stale VMEM; give them a safe
            # divisor BEFORE the divide, then zero them out below.
            factor = jnp.where(valid, factor, jnp.float32(1.0))
        pos = pos / factor

    if masked:
        pos = jnp.where(valid, pos, jnp.float32(0.0))

    out_ref[0] = jnp.sum(pos, axis=0, keepdims=True)              # (1, 1)


def _vmem_budget_bytes():
    """Per-generation (target bytes / input block, VMEM budget, scoped limit)."""
    phys = None
    try:
        phys = getattr(pltpu.get_tpu_info(), "vmem_capacity_bytes", None)
    except Exception:  # hardware query unavailable -> assume smallest chip
        phys = None
    if phys is not None and phys >= (100 << 20):
        # v5e / v6e: 128 MiB physical VMEM -> big blocks, raised scoped limit.
        return 8 << 20, 56 << 20, 64 << 20
    # v7x (64 MiB physical, 32 MiB scoped default) or unknown chip.
    return 4 << 20, 26 << 20, 32 << 20


def _choose_tb(B, C, itemsize, sub_mult, target_block_bytes, max_total_bytes):
    """Row tile: ~target bytes per pipelined input block, VMEM-budget safe.

    Accounting: 2 inputs x 2 pipeline buffers at the INPUT dtype plus ~2
    block-sized f32 temporaries for the in-kernel upcast / elementwise chain.
    Rows are sized at the lane-padded width ceil(C/128)*128.
    """
    lanes = _round_up(C, 128)
    in_row = lanes * itemsize              # HBM-side pipelined buffer rows
    f32_row = lanes * 4                    # in-kernel f32 temporaries
    per_row = 4 * in_row + 2 * f32_row
    tb = max(sub_mult, target_block_bytes // in_row)
    while tb > sub_mult and tb * per_row > max_total_bytes:
        tb //= 2
    return max(sub_mult, (tb // sub_mult) * sub_mult)


def map_loss_l2_pos_sum(onset_map_pred, onset_map, *, normalize=True,
                        scale=True, tb=None):
    """Pallas implementation of MapLossL2PosSum.forward (returns an f32 scalar)."""
    B, C = onset_map_pred.shape
    assert onset_map.shape == (B, C)

    itemsize = jnp.dtype(onset_map_pred.dtype).itemsize
    sub_mult = {4: 8, 2: 16, 1: 32}.get(itemsize, 8)   # dtype packing multiple
    target_block, vmem_budget, vmem_limit = _vmem_budget_bytes()

    if tb is None:
        tb = _choose_tb(B, C, itemsize, sub_mult, target_block, vmem_budget)
        # Keep >= ~4 blocks whenever B allows it so the "parallel" grid axis
        # actually splits across v7x's two TensorCores (harmless on the
        # single-TC v5e/v6e: just a few more cheap grid steps).
        tb = min(tb, max(sub_mult, _round_up(pl.cdiv(B, 4), sub_mult)))
    tb = max(sub_mult, (int(tb) // sub_mult) * sub_mult)
    tb = min(tb, _round_up(B, sub_mult))   # never tile bigger than one block of B

    num_blocks = pl.cdiv(B, tb)
    masked = (num_blocks * tb) != B        # last block overhangs the real batch

    kernel = functools.partial(_maploss_kernel, normalize=normalize,
                               scale=scale, tb=tb, batch=B, masked=masked)

    partials = pl.pallas_call(
        kernel,
        out_shape=jax.ShapeDtypeStruct((num_blocks, 1, 1), jnp.float32),
        grid_spec=pltpu.PrefetchScalarGridSpec(
            num_scalar_prefetch=0,
            grid=(num_blocks,),
            # cdiv grid directly on the UNPADDED inputs (no wrapper jnp.pad);
            # the last partial block is clipped by the pipeline and its stale
            # rows are masked in-kernel.
            in_specs=[
                pl.BlockSpec((tb, C), lambda i: (i, 0)),
                pl.BlockSpec((tb, C), lambda i: (i, 0)),
            ],
            # Each grid step owns its own (1,1,1) output block -> the grid
            # axis stays truly parallel.
            out_specs=pl.BlockSpec((1, 1, 1), lambda i: (i, 0, 0)),
        ),
        compiler_params=pltpu.CompilerParams(
            dimension_semantics=("parallel",),
            vmem_limit_bytes=vmem_limit),
    )(onset_map_pred, onset_map)

    # Final tiny reduction + mean over the TRUE batch size, in f32.
    return (jnp.sum(partials) / jnp.float32(B)).astype(jnp.float32)


def _reference(onset_map_pred, onset_map, normalize=True, scale=True):
    pred = onset_map_pred.astype(jnp.float32)
    tgt = onset_map.astype(jnp.float32)
    if normalize:
        maxes = jnp.max(pred, axis=1, keepdims=True)
        pred = pred / (maxes + 1e-6)
    pos = jnp.sum((tgt - pred * tgt) ** 2, axis=1)
    if scale:
        pos = pos / jnp.sum(tgt, axis=1)
    return jnp.mean(pos)


if __name__ == "__main__":
    key = jax.random.PRNGKey(0)

    # Case 1: ragged batch + small explicit tile -> 3-block grid whose last
    # block overhangs the real batch (exercises the no-pad masked path).
    k1, k2, key = jax.random.split(key, 3)
    B, C = 20, 128
    pred1 = jax.random.uniform(k1, (B, C), dtype=jnp.float32)
    tgt1 = jax.random.uniform(k2, (B, C), dtype=jnp.float32,
                              minval=0.1, maxval=1.0)
    out1 = jax.block_until_ready(map_loss_l2_pos_sum(pred1, tgt1, tb=8))
    ref1 = _reference(pred1, tgt1)
    assert jnp.allclose(out1, ref1, rtol=1e-5, atol=1e-5), (out1, ref1)

    # Case 2: auto tile size (min-blocks cap -> 2 blocks), non-128 channels.
    k1, k2, key = jax.random.split(key, 3)
    B, C = 16, 96
    pred2 = jax.random.uniform(k1, (B, C), dtype=jnp.float32)
    tgt2 = jax.random.uniform(k2, (B, C), dtype=jnp.float32,
                              minval=0.1, maxval=1.0)
    out2 = jax.block_until_ready(map_loss_l2_pos_sum(pred2, tgt2))
    ref2 = _reference(pred2, tgt2)
    assert jnp.allclose(out2, ref2, rtol=1e-5, atol=1e-5), (out2, ref2)

    # Case 3: bf16 inputs, auto tile (rounded to the 16-row bf16 packing
    # multiple) with a masked ragged edge; f32 math inside the kernel.
    k1, k2, key = jax.random.split(key, 3)
    B, C = 24, 128
    pred3 = jax.random.uniform(k1, (B, C), dtype=jnp.float32).astype(jnp.bfloat16)
    tgt3 = jax.random.uniform(k2, (B, C), dtype=jnp.float32,
                              minval=0.1, maxval=1.0).astype(jnp.bfloat16)
    out3 = jax.block_until_ready(map_loss_l2_pos_sum(pred3, tgt3))
    ref3 = _reference(pred3, tgt3)
    assert jnp.allclose(out3, ref3, rtol=1e-5, atol=1e-5), (out3, ref3)

    print("KERNEL_OK")
</pallas_src>

<mosaic_0001>
module attributes {stable_mosaic.version = 11 : i64} {
  func.func @_maploss_kernel(%arg0: i32, %arg1: memref<8x128xf32, #tpu.memory_space<vmem>>, %arg2: memref<8x128xf32, #tpu.memory_space<vmem>>, %arg3: memref<1x1x1xf32, #tpu.memory_space<vmem>>) attributes {dimension_semantics = [#tpu.dimension_semantics<parallel>], iteration_bounds = array<i64: 3>, scalar_prefetch = 0 : i64, scratch_operands = 0 : i64, tpu.core_type = #tpu.core_type<tc>, window_params = [{transform_indices = @transform_0, window_bounds = array<i64: 8, 128>}, {transform_indices = @transform_1, window_bounds = array<i64: 8, 128>}, {transform_indices = @transform_2, window_bounds = array<i64: 1, 1, 1>}]} {
    %c0 = arith.constant 0 : index
    %c0_0 = arith.constant 0 : index
    %0 = vector.load %arg1[%c0, %c0_0] : memref<8x128xf32, #tpu.memory_space<vmem>>, vector<8x128xf32>
    %c0_1 = arith.constant 0 : index
    %c0_2 = arith.constant 0 : index
    %1 = vector.load %arg2[%c0_1, %c0_2] : memref<8x128xf32, #tpu.memory_space<vmem>>, vector<8x128xf32>
    %cst = arith.constant dense<0xFF800000> : vector<8xf32>
    %2 = vector.multi_reduction <maximumf>, %0, %cst [1] : vector<8x128xf32> to vector<8xf32>
    %3 = vector.shape_cast %2 : vector<8xf32> to vector<8x1xf32>
    %cst_3 = arith.constant 9.99999997E-7 : f32
    %4 = vector.broadcast %cst_3 : f32 to vector<8x1xf32>
    %5 = arith.addf %3, %4 : vector<8x1xf32>
    %cst_4 = arith.constant 1.000000e+00 : f32
    %6 = vector.broadcast %cst_4 : f32 to vector<8x1xf32>
    %7 = arith.divf %6, %5 : vector<8x1xf32>
    %8 = vector.broadcast %7 : vector<8x1xf32> to vector<8x128xf32>
    %9 = arith.mulf %0, %8 : vector<8x128xf32>
    %10 = arith.mulf %9, %1 : vector<8x128xf32>
    %11 = arith.subf %1, %10 : vector<8x128xf32>
    %cst_5 = arith.constant 1.000000e+00 : f32
    %12 = vector.broadcast %cst_5 : f32 to vector<128x1xf32>
    %13 = arith.mulf %11, %11 : vector<8x128xf32>
    %cst_6 = arith.constant dense<0.000000e+00> : vector<8x1xf32>
    %14 = tpu.matmul %13, %12, %cst_6 {dimension_numbers = #tpu.dot_dimension_numbers<[1], [0], [0], [1], [0, 0, 1, 1], [], []>} : vector<8x128xf32>, vector<128x1xf32>, vector<8x1xf32> -> vector<8x1xf32>
    %c8_i32 = arith.constant 8 : i32
    %15 = arith.muli %arg0, %c8_i32 : i32
    %16 = tpu.iota {dimensions = array<i32: 0>} : vector<8x1xi32>
    %17 = vector.broadcast %15 : i32 to vector<8x1xi32>
    %18 = arith.addi %17, %16 : vector<8x1xi32>
    %c20_i32 = arith.constant 20 : i32
    %19 = vector.broadcast %c20_i32 : i32 to vector<8x1xi32>
    %20 = arith.cmpi slt, %18, %19 : vector<8x1xi32>
    %cst_7 = arith.constant dense<0.000000e+00> : vector<8x1xf32>
    %21 = tpu.matmul %1, %12, %cst_7 {dimension_numbers = #tpu.dot_dimension_numbers<[1], [0], [0], [1], [0, 0, 1, 1], [], []>} : vector<8x128xf32>, vector<128x1xf32>, vector<8x1xf32> -> vector<8x1xf32>
    %cst_8 = arith.constant 1.000000e+00 : f32
    %22 = vector.broadcast %cst_8 : f32 to vector<8x1xf32>
    %23 = arith.select %20, %21, %22 : vector<8x1xi1>, vector<8x1xf32>
    %24 = arith.divf %14, %23 : vector<8x1xf32>
    %cst_9 = arith.constant 0.000000e+00 : f32
    %25 = vector.broadcast %cst_9 : f32 to vector<8x1xf32>
    %26 = arith.select %20, %24, %25 : vector<8x1xi1>, vector<8x1xf32>
    %cst_10 = arith.constant dense<0.000000e+00> : vector<1xf32>
    %27 = vector.multi_reduction <add>, %26, %cst_10 [0] : vector<8x1xf32> to vector<1xf32>
    %28 = vector.shape_cast %27 : vector<1xf32> to vector<1x1xf32>
    %c0_11 = arith.constant 0 : index
    %c0_12 = arith.constant 0 : index
    %c0_13 = arith.constant 0 : index
    %29 = vector.load %arg3[%c0_11, %c0_12, %c0_13] : memref<1x1x1xf32, #tpu.memory_space<vmem>>, vector<1x1x1xf32>
    %30 = vector.shape_cast %29 : vector<1x1x1xf32> to vector<1x1xf32>
    %31 = vector.shape_cast %28 : vector<1x1xf32> to vector<1x1x1xf32>
    tpu.vector_store %arg3[%c0_11, %c0_12, %c0_13], %31 {strides = array<i32>} : memref<1x1x1xf32, #tpu.memory_space<vmem>>, vector<1x1x1xf32>,
    return
  }
  func.func @transform_0(%arg0: i32) -> (i32, i32) {
    %c0_i32 = arith.constant 0 : i32
    %c0_i32_0 = arith.constant 0 : i32
    return %arg0, %c0_i32 : i32, i32
  }
  func.func @transform_1(%arg0: i32) -> (i32, i32) {
    %c0_i32 = arith.constant 0 : i32
    %c0_i32_0 = arith.constant 0 : i32
    return %arg0, %c0_i32 : i32, i32
  }
  func.func @transform_2(%arg0: i32) -> (i32, i32, i32) {
    %c0_i32 = arith.constant 0 : i32
    %c0_i32_0 = arith.constant 0 : i32
    %c0_i32_1 = arith.constant 0 : i32
    return %arg0, %c0_i32, %c0_i32_0 : i32, i32, i32
  }
}

</mosaic_0001>

<bundles_post_ra>
// kernel: tpu_custom_call.1
= control target key start
LH: loop header
LB: loop body
LE: loop exit
PB: predicated region body
PF: predicated region fallthrough
CT: control target
= control target key end

     0   :  { %7 = vsyncpa [#allocation3], 0  ;;  %s927_s0 = inlined_call_operand.hbm [shape: f32[20,128], index: 0, kind: input, shape index: {}]   ;;  %s928_s1 = inlined_call_operand.hbm [shape: f32[20,128], index: 1, kind: input, shape index: {}]   ;;  %s929_s2 = inlined_call_operand.vmem [shape: f32[3,1,1], index: 2, kind: output, shape index: {}]  }
   0x1   :  { %9 = vsyncpa [#allocation3 + $0x1], 0 }
   0x2   :  { %10 = vsyncpa [#allocation5], 0 }
   0x3   :  { %12 = vsyncpa [#allocation5 + $0x1], 0  ;;  %s769_s9 = smov 0   ;;  %s771_s10 = smov 0  }
   0x4   :  { %s773_s11 = smov 0   ;;  %s775_s12 = smov 0  }
   0x5 LB: > { %s788_s13 = sadd.s32 4294967295, %s746_s12   ;;  %s791_s14 = sadd.s32 1, %s746_s12   ;;  %s746_s12 = sphi %s775_s12, %s941_s12   ;;  %s742_s11 = sphi %s773_s11, %s940_s11   ;;  %s738_s10 = sphi %s771_s10, %s939_s10   ;;  %s734_s9 = sphi %s769_s9, %s938_s9  }
   0x6   : > { %s22_s15 = ssub.s32 %s746_s12, %s791_s14  ;;  %s25_s16 = sadd.s32 1, %s742_s11 }
   0x7   : > { %p23_p0 = scmp.eq.s32.totalorder %s22_s15, 0  ;;  %p32_p1 = scmp.ne.s32.totalorder %s742_s11, %s738_s10 }
   0x8   : > { %p33_p2 = scmp.eq.s32.totalorder %s746_s12, 0  ;;  %p38_p3 = scmp.ne.s32.totalorder %s738_s10, %s734_s9 }
   0x9   : > { %s801_s17 = scalar_select %p23_p0, %s742_s11, %s25_s16  }
   0xa   : > { %p34_p4 = por %p33_p2, %p32_p1  ;;  %p39_p5 = scmp.eq.s32.totalorder %s788_s13, 0 }
   0xb   : > { %p607_p6 = scmp.lt.s32.totalorder %s746_s12, 3  ;;  %s810_s19 = sand.u32 1, %s742_s11  }
   0xc   : > { %p805_p7 = por %p39_p5, %p38_p3  ;;  %s450_s20 = sshll.u32 %s810_s19, 3 }
   0xd   : > { %s451_s21 = sshll.u32 %s746_s12, 7  ;;  %s118_s25 = scalar_lea.vmem [#allocation2], %s450_s20 }
   0xe   : > { %s931_s18 = scalar_select %p805_p7, 1, 0 }
   0xf   : > { %s819_s24 = scalar_lea.hbm %s927_s0, %s451_s21  ;;  %s125_s26 = sshll.u32 %s118_s25, 4  ;;  %s823_s26 = int_to_ptr.vmem [resolvable:$true] %s125_s26 }
  0x10   : > { %p825_p8 = pnand %p607_p6, %p34_p4  ;;  %s115_s28 = scalar_lea.sflag [#allocation3], %s810_s19 }
  0x11   : > { %s648_s29 = scalar_lea.hbm %s819_s24, 128  ;;  %s653_s4 = scalar_lea.hbm %s927_s0, 384 }
  0x12   : > { %p649_p11 = scmp.ne.s32.totalorder %s819_s24, %s648_s29  ;;  %p650_p12 = pneg %p825_p8 }
  0x13   : > { %p654_p1 = scmp.lt.u32.totalorder %s819_s24, %s927_s0  ;;  %p655_p2 = scmp.lt.u32.totalorder %s653_s4, %s648_s29 }
  0x14   : > { %p651_p13 = pnand %p650_p12, %p649_p11  ;;  %p657_p4 = scmp.lt.u32.totalorder %s648_s29, %s819_s24 }
  0x15   : > { %p656_p3 = por %p655_p2, %p654_p1 }
  0x16   : > { %p652_p0 = pneg %p651_p13 }
  0x17   : > { %p658_p5 = por %p657_p4, %p656_p3 }
  0x19   : > { %p659_p6 = pnand %p658_p5, %p652_p0 }
  0x1b   : > { %662 = shalt.err (!%p659_p6)
}
  0x1c   : > { %s663_s7 = scalar_lea.vmem %s823_s26, 128  ;;  %s748_s8 = smov [#allocation2]  }
  0x1d   : > { %p664_p11 = scmp.ne.s32.totalorder %s823_s26, %s663_s7  ;;  %s668_s9 = sshll.u32 %s748_s8, 4  ;;  %s669_s9 = int_to_ptr.vmem [resolvable:$false] %s668_s9 }
  0x1e   : > { %s670_s15 = scalar_lea.vmem %s669_s9, 256  ;;  %p671_p10 = scmp.lt.s32.totalorder %s823_s26, %s669_s9 }
  0x1f   : > { %p666_p13 = pnand %p664_p11, %p650_p12  ;;  %p672_p1 = scmp.lt.s32.totalorder %s670_s15, %s663_s7 }
  0x21   : > { %p667_p9 = pneg %p666_p13  ;;  %p673_p2 = por %p672_p1, %p671_p10 }
  0x23   : > { %p674_p3 = pnand %p673_p2, %p667_p9 }
  0x25   : > { %677 = shalt.err (!%p674_p3)
}
  0x26   : > { %603 = dma.hbm_to_vmem [thread:$0]  (!%p825_p8), %s819_s24, 128, %s823_s26, %s115_s28  }
  0x27   : > { %p933_p0 = scmp.lt.s32.totalorder %s746_s12, 4  ;;  %p934_p4 = scmp.ge.s32.totalorder %s746_s12, 1 }
  0x28   : > { %s870_s25 = scalar_lea.hbm %s928_s1, %s451_s21  ;;  %s136_s29 = scalar_lea.vmem [#allocation4], %s450_s20 }
  0x29   : > { %p861_p5 = pnand %p934_p4, %p933_p0  ;;  %s143_s30 = sshll.u32 %s136_s29, 4  ;;  %s144_s30 = int_to_ptr.vmem [resolvable:$true] %s143_s30 }
  0x2a   : > { %s133_s24 = scalar_lea.sflag [#allocation5], %s810_s19  ;;  %s678_s26 = scalar_lea.hbm %s870_s25, 128 }
  0x2b   : > { %s935_s16 = scalar_select %p861_p5, 1, 0 }
  0x2c   : > { %p679_p9 = scmp.ne.s32.totalorder %s870_s25, %s678_s26  ;;  %s683_s21 = scalar_lea.hbm %s928_s1, 384 }
  0x2d   : > { %p684_p11 = scmp.lt.u32.totalorder %s870_s25, %s928_s1  ;;  %p685_p13 = scmp.lt.u32.totalorder %s683_s21, %s678_s26 }
  0x2e   : > { %p681_p10 = pnand %p679_p9, %p650_p12  ;;  %p687_p2 = scmp.lt.u32.totalorder %s678_s26, %s870_s25 }
  0x2f   : > { %p686_p1 = por %p685_p13, %p684_p11 }
  0x30   : > { %p682_p6 = pneg %p681_p10 }
  0x31   : > { %p688_p3 = por %p687_p2, %p686_p1 }
  0x33   : > { %p689_p0 = pnand %p688_p3, %p682_p6 }
  0x35   : > { %692 = shalt.err (!%p689_p0)
}
  0x36   : > { %s693_s19 = scalar_lea.vmem %s144_s30, 128  ;;  %s749_s20 = smov [#allocation4]  }
  0x37   : > { %p694_p4 = scmp.ne.s32.totalorder %s144_s30, %s693_s19  ;;  %s698_s5 = sshll.u32 %s749_s20, 4  ;;  %s699_s5 = int_to_ptr.vmem [resolvable:$false] %s698_s5 }
  0x38   : > { %s700_s6 = scalar_lea.vmem %s699_s5, 256  ;;  %p701_p7 = scmp.lt.s32.totalorder %s144_s30, %s699_s5 }
  0x39   : > { %p696_p9 = pnand %p694_p4, %p650_p12  ;;  %p702_p5 = scmp.lt.s32.totalorder %s700_s6, %s693_s19 }
  0x3b   : > { %p697_p10 = pneg %p696_p9  ;;  %p703_p11 = por %p702_p5, %p701_p7 }
  0x3d   : > { %p704_p13 = pnand %p703_p11, %p697_p10 }
  0x3f   : > { %707 = shalt.err (!%p704_p13)
}
  0x40   : > { %606 = dma.hbm_to_vmem [thread:$0]  (!%p825_p8), %s870_s25, 128, %s144_s30, %s133_s24  }
  0x41   : > { %p936_p6 = scmp.ne.s32.totalorder %s935_s16, 0 }
  0x42   : > { %s154_s7 = sand.u32 (!%p936_p6), 1, %s738_s10   ;;  %p937_p12 = scmp.ne.s32.totalorder (!%p936_p6), %s931_s18, 0 }
  0x43   : > { %152 = sbr.rel (%p936_p6) target bundleno = 473 (0x1d9), region = 28  ;;  %s455_s8 = sshll.u32 (!%p936_p6), %s154_s7, 3 }
  0x44   : > { %s155_s9 = scalar_lea.sflag (!%p936_p6), [#allocation3], %s154_s7  ;;  %s158_s15 = scalar_lea.vmem (!%p936_p6), [#allocation2], %s455_s8 }
  0x4a   : > { %725 = dma.done.wait (%p937_p12), %s155_s9, 128  }
  0x4b   : > { %727 = vsyncadd (%p937_p12), %s155_s9, 4294967168  ;;  %s164_s22 = scalar_lea.sflag [#allocation5], %s154_s7  ;;  %s901_s23 = scalar_lea.vmem [#allocation4], %s455_s8 }
  0x4c   : > { %729 = dma.done.wait (%p937_p12), %s164_s22, 128  }
  0x4d   : > { %731 = vsyncadd (%p937_p12), %s164_s22, 4294967168  ;;  %v750_v0 = vmov 0.0|0.0   ;;  %v751_v1 = vmov 1.0|1.0   ;;  %v194_v2 = vld [vmem:[%s158_s15] sm:$0xff]  ;;  %vm752_vm0 = vmmov 0   ;;  %v276_v14 = vlaneseq }
  0x4e   : > { %580 = vmatprep.subr.bf16.mxu1 %v750_v0  ;;  %564 = vmatprep.subr.bf16.mxu0 %v750_v0  ;;  %v753_v3 = vmov 0.0   ;;  %v195_v4 = vld [vmem:[%s901_s23] sm:$0xff]  ;;  %s457_s18 = sshll.u32 %s788_s13, 3  ;;  %vm355_vm2 = vcmask 7168   ;;  %p191_p7 = scmp.lt.s32.totalorder %s788_s13, 2  ;;  %vm363_vm3 = vcmask 0  }
  0x4f   : > { %581 = vmatpush3.bf16.msra.mxu1 %v751_v1  ;;  %565 = vmatpush3.bf16.msra.mxu0 %v751_v1  ;;  %v277_v15 = vshrl.u32 %v276_v14, 7  ;;  %v278_v16 = vstv %s457_s18 }
  0x50   : > { %582 = vmatprep.subr.bf16.mxu1 %v750_v0  ;;  %566 = vmatprep.subr.bf16.mxu0 %v750_v0  ;;  %s943_s13 = smov (!%p191_p7, %s788_s13), 2 }
  0x51   : > { %196 = vmax.xlane.f32.xlu0 %v194_v2  ;;  %561 = vmatprep.mubr.msk.f32.mxu1 %vm752_vm0, %v753_v3  ;;  %v279_v17 = vadd.s32 %v278_v16, %v277_v15  ;;  %s193_s25 = scalar_lea.vmem %s929_s2, %s943_s13 }
  0x52   : > { %526 = vmatprep.mubr.msk.f32.mxu0 %vm752_vm0, %v753_v3 }
  0x53   : > { %583 = vmatpush3.bf16.msra.mxu1 %v751_v1  ;;  %567 = vmatpush3.bf16.msra.mxu0 %v751_v1  ;;  %vm280_vm1 = vcmp.lt.s32.totalorder %v279_v17, 20 }
  0x54   : > { %584 = vmatprep.subr.bf16.mxu1 %v750_v0  ;;  %568 = vmatprep.subr.bf16.mxu0 %v750_v0 }
  0x57   : > { %585 = vmatpush3.bf16.msra.mxu1 %v751_v1  ;;  %569 = vmatpush3.bf16.msra.mxu0 %v751_v1 }
  0x58   : > { %586 = vmatprep.subr.bf16.mxu1 %v750_v0  ;;  %570 = vmatprep.subr.bf16.mxu0 %v750_v0 }
  0x5b   : > { %587 = vmatpush3.bf16.msra.mxu1 %v751_v1  ;;  %571 = vmatpush3.bf16.msra.mxu0 %v751_v1 }
  0x5c   : > { %588 = vmatprep.subr.bf16.mxu1 %v750_v0  ;;  %572 = vmatprep.subr.bf16.mxu0 %v750_v0 }
  0x5f   : > { %589 = vmatpush3.bf16.msra.mxu1 %v751_v1  ;;  %573 = vmatpush3.bf16.msra.mxu0 %v751_v1 }
  0x60   : > { %590 = vmatprep.subr.bf16.mxu1 %v750_v0  ;;  %574 = vmatprep.subr.bf16.mxu0 %v750_v0 }
  0x63   : > { %591 = vmatpush3.bf16.msra.mxu1 %v751_v1  ;;  %575 = vmatpush3.bf16.msra.mxu0 %v751_v1 }
  0x64   : > { %592 = vmatprep.subr.bf16.mxu1 %v750_v0  ;;  %576 = vmatprep.subr.bf16.mxu0 %v750_v0 }
  0x67   : > { %593 = vmatpush3.bf16.msra.mxu1 %v751_v1  ;;  %577 = vmatpush3.bf16.msra.mxu0 %v751_v1 }
  0x68   : > { %594 = vmatprep.subr.bf16.mxu1 %v750_v0  ;;  %578 = vmatprep.subr.bf16.mxu0 %v750_v0 }
  0x6b   : > { %595 = vmatpush3.bf16.msra.mxu1 %v751_v1  ;;  %579 = vmatpush3.bf16.msra.mxu0 %v751_v1 }
  0x6e   : > { %562 = vmatmul.mubr.f32.vlgmr.msra.gmra.mrb[0].mxu1 %v195_v4 }
  0xde   : > { %v197_v5 = vpop.xlane.xlu0 %196 }
  0xdf   : > { %v198_v6 = vadd.f32 1e-06, %v197_v5 }
  0xe1   : > { %644 = vrcp.f32 %v198_v6 }
  0xeb   : > { %v645_v7 = vpop.eup %644 }
  0xec   : > { %v201_v8 = vmul.f32 %v645_v7, %v194_v2 }
  0xee   : > { %v202_v9 = vmul.f32 %v201_v8, %v195_v4 }
  0xf0   : > { %v203_v10 = vsub.f32 %v195_v4, %v202_v9 }
  0xf2   : > { %v204_v11 = vmul.f32 %v203_v10, %v203_v10 }
  0xf4   : > { %527 = vmatmul.mubr.f32.vlgmr.msra.gmra.mrb[0].mxu0 %v204_v11 }
 0x141   : > { %v347_v12 = vpop.f32.mrb[0].mxu1 }
 0x142   : > { %v563_v13 = vpop.f32.mrb[1].mxu1  ;;  %v351_v18 = vsel %vm280_vm1, %v347_v12, 1.0 }
 0x143   : > { %646 = vrcp.f32 %v351_v18 }
 0x14d   : > { %v647_v19 = vpop.eup %646 }
 0x1c7   : > { %v271_v20 = vpop.f32.mrb[0].mxu0 }
 0x1c8   : > { %v353_v21 = vmul.f32 %v647_v19, %v271_v20  ;;  %v528_v22 = vpop.f32.mrb[1].mxu0 }
 0x1ca   : > { %v354_v23 = vsel %vm280_vm1, %v353_v21, 0.0 }
 0x1cb   : > { %v356_v24 = vsel %vm355_vm2, %v354_v23, 0.0 }
 0x1cc   : > { %v357_v25 = vrot.slane %v356_v24, 4 }
 0x1ce   : > { %v358_v26 = vadd.f32 %v357_v25, %v356_v24 }
 0x1d0   : > { %v359_v27 = vrot.slane %v358_v26, 2 }
 0x1d2   : > { %v360_v28 = vadd.f32 %v359_v27, %v358_v26 }
 0x1d4   : > { %v361_v29 = vrot.slane %v360_v28, 1 }
 0x1d6   : > { %v362_v30 = vadd.f32 %v361_v29, %v360_v28 }
 0x1d8   : > { %364 = vst.msk [vmem:[%s193_s25] sm:$0x1] %vm363_vm3, %v362_v30 }
 0x1d9 PF: > { %p15_p8 = scmp.ge.s32.totalorder %s791_s14, 5   ;;  %s938_s9 = smov %s738_s10 }
 0x1da   : > { %s939_s10 = smov %s742_s11  ;;  %s940_s11 = smov %s801_s17 }
 0x1db   : > { %s941_s12 = smov %s791_s14  ;;  %17 = sbr.rel (!%p15_p8) target bundleno = 5 (0x5), region = 81 }
 0x1e2   :  { %382 = vsyncpa [#allocation3], 1 }
 0x1e3   :  { %384 = vsyncpa [#allocation3 + $0x1], 1 }
 0x1e4   :  { %385 = vsyncpa [#allocation5], 1 }
 0x1e5   :  { %387 = vsyncpa [#allocation5 + $0x1], 1 }

</bundles_post_ra>
